<compile_context>
chip_gen: v6e
topology: v6e:2x2x1
jax: 0.10.0
libtpu: 0.0.40
codegen_flags: <defaults>
</compile_context>

<pallas_src>
import functools

import jax
import jax.numpy as jnp
from jax.experimental import pallas as pl
from jax.experimental.pallas import tpu as pltpu

_EPS = 1e-6
_LANE = 128
_SUBLANE = 8


def _round_up(a, b):
    return (a + b - 1) // b * b


def _vmem_capacity_bytes():
    """Physical VMEM of the local TPU generation (conservative fallback)."""
    try:
        info = pltpu.get_tpu_info()
        for name in ("vmem_capacity_bytes", "vmem_size_bytes", "vmem_bytes"):
            cap = getattr(info, name, None)
            if cap:
                return int(cap)
    except Exception:
        pass
    return 64 * 1024 * 1024  # v7x-sized assumption: safe on every generation


def _tversky_sums_kernel(x_ref, t_ref, stx_ref, st_ref, sx_ref, *,
                         n_chunks, acc_w):
    """Accumulate sum(t*x), sum(t), sum(x) per row over the HW grid axis."""
    k = pl.program_id(1)

    @pl.when(k == 0)
    def _():
        stx_ref[...] = jnp.zeros_like(stx_ref)
        st_ref[...] = jnp.zeros_like(st_ref)
        sx_ref[...] = jnp.zeros_like(sx_ref)

    # Lane-parallel partial sums: fold the (tile_nc, tile_hw) input block into
    # the (tile_nc, acc_w) resident accumulators with static, vreg-aligned
    # slices.  Pure VPU work; the one cross-lane reduce happens in the wrapper.
    for c in range(n_chunks):
        sl = slice(c * acc_w, (c + 1) * acc_w)
        xs = x_ref[:, sl].astype(jnp.float32)
        ts = t_ref[:, sl].astype(jnp.float32)
        stx_ref[...] += ts * xs
        st_ref[...] += ts
        sx_ref[...] += xs


def tversky_loss(x, target, alpha=0.5, beta=0.5):
    """Pallas TPU Tversky loss.  x, target: (N, C, H, W) arrays."""
    assert x.shape == target.shape and x.ndim == 4
    N, C, H, W = x.shape
    NC, HW = N * C, H * W
    itemsize = jnp.dtype(x.dtype).itemsize

    # ---- generation-aware tile selection --------------------------------
    vmem_cap = _vmem_capacity_bytes()
    # Raise the scoped-VMEM limit but leave headroom (~48 MiB on v7x,
    # ~96 MiB on v5e/v6e).
    vmem_limit = min((vmem_cap * 3) // 4, 96 * 1024 * 1024)
    # 2 inputs x 2 pipeline buffers must fit inside this slice of the budget.
    input_budget = (vmem_limit * 55) // 100

    nc_pad = _round_up(NC, _SUBLANE)
    tile_nc = min(nc_pad, 256)
    nc_pad = _round_up(nc_pad, tile_nc)

    max_tile_hw = input_budget // (4 * tile_nc * itemsize)
    max_tile_hw = max(_LANE, (max_tile_hw // _LANE) * _LANE)
    max_tile_hw = min(max_tile_hw, 32768)  # bound per-step footprint / unroll

    hw_pad = _round_up(HW, _LANE)
    if max_tile_hw >= hw_pad:
        # Whole (padded) spatial extent in a single grid step.
        tile_hw = hw_pad
        acc_w = next(w for w in (1024, 512, 256, 128) if tile_hw % w == 0)
    else:
        acc_w = min(1024, max_tile_hw)
        tile_hw = (max_tile_hw // acc_w) * acc_w
        hw_pad = _round_up(HW, tile_hw)
    n_chunks = tile_hw // acc_w

    # ---- flatten & zero-pad to a lane-dense slab -------------------------
    x2 = x.reshape(NC, HW)
    t2 = target.reshape(NC, HW)
    if nc_pad != NC or hw_pad != HW:
        pad = ((0, nc_pad - NC), (0, hw_pad - HW))
        x2 = jnp.pad(x2, pad)  # zeros contribute 0 to every streamed sum
        t2 = jnp.pad(t2, pad)

    grid = (nc_pad // tile_nc, hw_pad // tile_hw)

    kernel = functools.partial(_tversky_sums_kernel,
                               n_chunks=n_chunks, acc_w=acc_w)

    acc_sds = jax.ShapeDtypeStruct((nc_pad, acc_w), jnp.float32)
    in_spec = pl.BlockSpec((tile_nc, tile_hw), lambda i, k: (i, k))
    acc_spec = pl.BlockSpec((tile_nc, acc_w), lambda i, k: (i, 0))

    cost = pl.CostEstimate(
        flops=4 * nc_pad * hw_pad,
        transcendentals=0,
        bytes_accessed=2 * nc_pad * hw_pad * itemsize + 3 * nc_pad * acc_w * 4,
    )

    s_tx, s_t, s_x = pl.pallas_call(
        kernel,
        out_shape=(acc_sds, acc_sds, acc_sds),
        grid_spec=pltpu.PrefetchScalarGridSpec(
            num_scalar_prefetch=0,
            grid=grid,
            in_specs=[in_spec, in_spec],
            out_specs=[acc_spec, acc_spec, acc_spec],
        ),
        compiler_params=pltpu.CompilerParams(
            dimension_semantics=("parallel", "arbitrary"),
            vmem_limit_bytes=int(vmem_limit)),
        cost_estimate=cost,
    )(x2, t2)

    # ---- tiny finalize in the wrapper (drop padded rows first) ----------
    num = jnp.sum(s_tx[:NC], axis=1)      # sum(t * x)  per (n, c)
    sum_t = jnp.sum(s_t[:NC], axis=1)     # sum(t)      per (n, c)
    sum_x = jnp.sum(s_x[:NC], axis=1)     # sum(x)      per (n, c)
    # a = sum(t*(1-x)) = sum(t) - num ; b = sum((1-t)*x) = sum(x) - num
    den = num + alpha * (sum_t - num) + beta * (sum_x - num)
    ratio = (num + _EPS) / (den + _EPS)
    t_value = jnp.sum(ratio.reshape(N, C), axis=1)   # (N,)
    return jnp.mean(C - t_value)


def _tversky_ref(x, target, alpha=0.5, beta=0.5):
    """Pure-JAX reference mirroring the PyTorch forward."""
    p0, p1 = target, 1.0 - target
    g0, g1 = x, 1.0 - x
    num = jnp.sum(p0 * g0, axis=(2, 3))
    den = num + alpha * jnp.sum(p0 * g1, axis=(2, 3)) \
              + beta * jnp.sum(p1 * g0, axis=(2, 3))
    t_value = jnp.sum((num + _EPS) / (den + _EPS), axis=1)
    n_classes = x.shape[1] * jnp.ones((x.shape[0],), jnp.float32)
    return jnp.mean(n_classes - t_value)


if __name__ == "__main__":
    # Case 1: canonical small shape.
    kx, kt = jax.random.split(jax.random.PRNGKey(0))
    N, C, H, W = 2, 4, 16, 16
    x = jax.random.uniform(kx, (N, C, H, W), dtype=jnp.float32)
    target = (jax.random.uniform(kt, (N, C, H, W)) > 0.5).astype(jnp.float32)

    loss = tversky_loss(x, target, alpha=0.5, beta=0.5)
    jax.block_until_ready(loss)
    ref = _tversky_ref(x, target, alpha=0.5, beta=0.5)
    assert jnp.allclose(loss, ref, rtol=1e-5, atol=1e-5), (loss, ref)

    # Case 2: odd shape exercising the NC / HW zero-padding path.
    kx2, kt2 = jax.random.split(jax.random.PRNGKey(1))
    N2, C2, H2, W2 = 2, 3, 10, 12
    x_b = jax.random.uniform(kx2, (N2, C2, H2, W2), dtype=jnp.float32)
    t_b = (jax.random.uniform(kt2, (N2, C2, H2, W2)) > 0.5).astype(jnp.float32)

    loss_b = tversky_loss(x_b, t_b, alpha=0.3, beta=0.7)
    jax.block_until_ready(loss_b)
    ref_b = _tversky_ref(x_b, t_b, alpha=0.3, beta=0.7)
    assert jnp.allclose(loss_b, ref_b, rtol=1e-5, atol=1e-5), (loss_b, ref_b)

    print("KERNEL_OK")
</pallas_src>

<mosaic_0001>
module attributes {stable_mosaic.version = 11 : i64} {
  func.func @_tversky_sums_kernel(%arg0: i32, %arg1: i32, %arg2: memref<8x256xf32, #tpu.memory_space<vmem>>, %arg3: memref<8x256xf32, #tpu.memory_space<vmem>>, %arg4: memref<8x256xf32, #tpu.memory_space<vmem>>, %arg5: memref<8x256xf32, #tpu.memory_space<vmem>>, %arg6: memref<8x256xf32, #tpu.memory_space<vmem>>) attributes {dimension_semantics = [#tpu.dimension_semantics<parallel>, #tpu.dimension_semantics<arbitrary>], iteration_bounds = array<i64: 1, 1>, scalar_prefetch = 0 : i64, scratch_operands = 0 : i64, tpu.core_type = #tpu.core_type<tc>, window_params = [{transform_indices = @transform_0, window_bounds = array<i64: 8, 256>}, {transform_indices = @transform_1, window_bounds = array<i64: 8, 256>}, {transform_indices = @transform_2, window_bounds = array<i64: 8, 256>}, {transform_indices = @transform_3, window_bounds = array<i64: 8, 256>}, {transform_indices = @transform_4, window_bounds = array<i64: 8, 256>}]} {
    %c0_i32 = arith.constant 0 : i32
    %0 = arith.cmpi eq, %arg1, %c0_i32 : i32
    %1 = arith.extui %0 : i1 to i32
    %c0_i32_0 = arith.constant 0 : i32
    %2 = arith.cmpi ne, %1, %c0_i32_0 : i32
    scf.if %2 {
      %cst = arith.constant 0.000000e+00 : f32
      %15 = vector.broadcast %cst : f32 to vector<8x256xf32>
      %c0_16 = arith.constant 0 : index
      %c0_17 = arith.constant 0 : index
      %16 = vector.load %arg4[%c0_16, %c0_17] : memref<8x256xf32, #tpu.memory_space<vmem>>, vector<8x256xf32>
      tpu.vector_store %arg4[%c0_16, %c0_17], %15 {strides = array<i32>} : memref<8x256xf32, #tpu.memory_space<vmem>>, vector<8x256xf32>,
      %cst_18 = arith.constant 0.000000e+00 : f32
      %17 = vector.broadcast %cst_18 : f32 to vector<8x256xf32>
      %c0_19 = arith.constant 0 : index
      %c0_20 = arith.constant 0 : index
      %18 = vector.load %arg5[%c0_19, %c0_20] : memref<8x256xf32, #tpu.memory_space<vmem>>, vector<8x256xf32>
      tpu.vector_store %arg5[%c0_19, %c0_20], %17 {strides = array<i32>} : memref<8x256xf32, #tpu.memory_space<vmem>>, vector<8x256xf32>,
      %cst_21 = arith.constant 0.000000e+00 : f32
      %19 = vector.broadcast %cst_21 : f32 to vector<8x256xf32>
      %c0_22 = arith.constant 0 : index
      %c0_23 = arith.constant 0 : index
      %20 = vector.load %arg6[%c0_22, %c0_23] : memref<8x256xf32, #tpu.memory_space<vmem>>, vector<8x256xf32>
      tpu.vector_store %arg6[%c0_22, %c0_23], %19 {strides = array<i32>} : memref<8x256xf32, #tpu.memory_space<vmem>>, vector<8x256xf32>,
    } else {
    }
    %c0 = arith.constant 0 : index
    %c0_1 = arith.constant 0 : index
    %3 = vector.load %arg2[%c0, %c0_1] : memref<8x256xf32, #tpu.memory_space<vmem>>, vector<8x256xf32>
    %c0_2 = arith.constant 0 : index
    %c0_3 = arith.constant 0 : index
    %4 = vector.load %arg3[%c0_2, %c0_3] : memref<8x256xf32, #tpu.memory_space<vmem>>, vector<8x256xf32>
    %c0_4 = arith.constant 0 : index
    %c0_5 = arith.constant 0 : index
    %5 = vector.load %arg4[%c0_4, %c0_5] : memref<8x256xf32, #tpu.memory_space<vmem>>, vector<8x256xf32>
    %6 = arith.mulf %4, %3 : vector<8x256xf32>
    %7 = arith.addf %5, %6 : vector<8x256xf32>
    %c0_6 = arith.constant 0 : index
    %c0_7 = arith.constant 0 : index
    %8 = vector.load %arg4[%c0_6, %c0_7] : memref<8x256xf32, #tpu.memory_space<vmem>>, vector<8x256xf32>
    tpu.vector_store %arg4[%c0_6, %c0_7], %7 {strides = array<i32>} : memref<8x256xf32, #tpu.memory_space<vmem>>, vector<8x256xf32>,
    %c0_8 = arith.constant 0 : index
    %c0_9 = arith.constant 0 : index
    %9 = vector.load %arg5[%c0_8, %c0_9] : memref<8x256xf32, #tpu.memory_space<vmem>>, vector<8x256xf32>
    %10 = arith.addf %9, %4 : vector<8x256xf32>
    %c0_10 = arith.constant 0 : index
    %c0_11 = arith.constant 0 : index
    %11 = vector.load %arg5[%c0_10, %c0_11] : memref<8x256xf32, #tpu.memory_space<vmem>>, vector<8x256xf32>
    tpu.vector_store %arg5[%c0_10, %c0_11], %10 {strides = array<i32>} : memref<8x256xf32, #tpu.memory_space<vmem>>, vector<8x256xf32>,
    %c0_12 = arith.constant 0 : index
    %c0_13 = arith.constant 0 : index
    %12 = vector.load %arg6[%c0_12, %c0_13] : memref<8x256xf32, #tpu.memory_space<vmem>>, vector<8x256xf32>
    %13 = arith.addf %12, %3 : vector<8x256xf32>
    %c0_14 = arith.constant 0 : index
    %c0_15 = arith.constant 0 : index
    %14 = vector.load %arg6[%c0_14, %c0_15] : memref<8x256xf32, #tpu.memory_space<vmem>>, vector<8x256xf32>
    tpu.vector_store %arg6[%c0_14, %c0_15], %13 {strides = array<i32>} : memref<8x256xf32, #tpu.memory_space<vmem>>, vector<8x256xf32>,
    return
  }
  func.func @transform_0(%arg0: i32, %arg1: i32) -> (i32, i32) {
    %c0_i32 = arith.constant 0 : i32
    return %arg0, %arg1 : i32, i32
  }
  func.func @transform_1(%arg0: i32, %arg1: i32) -> (i32, i32) {
    %c0_i32 = arith.constant 0 : i32
    return %arg0, %arg1 : i32, i32
  }
  func.func @transform_2(%arg0: i32, %arg1: i32) -> (i32, i32) {
    %c0_i32 = arith.constant 0 : i32
    %c0_i32_0 = arith.constant 0 : i32
    return %arg0, %c0_i32 : i32, i32
  }
  func.func @transform_3(%arg0: i32, %arg1: i32) -> (i32, i32) {
    %c0_i32 = arith.constant 0 : i32
    %c0_i32_0 = arith.constant 0 : i32
    return %arg0, %c0_i32 : i32, i32
  }
  func.func @transform_4(%arg0: i32, %arg1: i32) -> (i32, i32) {
    %c0_i32 = arith.constant 0 : i32
    %c0_i32_0 = arith.constant 0 : i32
    return %arg0, %c0_i32 : i32, i32
  }
}

</mosaic_0001>

<bundles_post_ra>
// kernel: tpu_custom_call.1
= control target key start
LH: loop header
LB: loop body
LE: loop exit
PB: predicated region body
PF: predicated region fallthrough
CT: control target
= control target key end

     0   :  { %10 = vsyncpa [#allocation3], 0  ;;  %s276_s0 = inlined_call_operand.hbm [shape: f32[8,256], index: 0, kind: input, shape index: {}]   ;;  %s277_s1 = inlined_call_operand.hbm [shape: f32[8,256], index: 1, kind: input, shape index: {}]   ;;  %s278_s2 = inlined_call_operand.hbm [shape: f32[8,256], index: 2, kind: output, shape index: {0}]   ;;  %s279_s3 = inlined_call_operand.hbm [shape: f32[8,256], index: 3, kind: output, shape index: {1}]   ;;  %s280_s4 = inlined_call_operand.hbm [shape: f32[8,256], index: 4, kind: output, shape index: {2}]  }
   0x1   :  { %11 = vsyncpa [#allocation6], 0 }
   0x2   :  { %12 = vsyncpa [#allocation4], 0 }
   0x3   :  { %13 = vsyncpa [#allocation9], 0  ;;  %s231_s15 = smov [#allocation2]   ;;  %s232_s17 = smov [#allocation5]  }
   0x4   :  { %s20_s16 = sshll.u32 %s231_s15, 4  ;;  %s30_s18 = sshll.u32 %s232_s17, 4  ;;  %s21_s16 = int_to_ptr.vmem [resolvable:$true] %s20_s16  ;;  %s31_s18 = int_to_ptr.vmem [resolvable:$true] %s30_s18 }
   0x5   :  { %s131_s19 = scalar_lea.vmem %s21_s16, 256  ;;  %p136_p1 = scmp.lt.s32.totalorder %s21_s16, %s21_s16 }
   0x6   :  { %p132_p0 = scmp.ne.s32.totalorder %s21_s16, %s131_s19  ;;  %p137_p2 = scmp.lt.s32.totalorder %s131_s19, %s131_s19 }
   0x8   :  { %p138_p3 = por %p137_p2, %p136_p1 }
   0xa   :  { %p139_p4 = pnand %p138_p3, %p132_p0 }
   0xc   :  { %142 = shalt.err (!%p139_p4)
}
   0xd   :  { %23 = dma.hbm_to_vmem [thread:$0]  %s276_s0, 256, %s21_s16, [#allocation3]  }
   0xe   :  { %s151_s22 = scalar_lea.vmem %s31_s18, 256  ;;  %p156_p6 = scmp.lt.s32.totalorder %s31_s18, %s31_s18 }
   0xf   :  { %p152_p5 = scmp.ne.s32.totalorder %s31_s18, %s151_s22  ;;  %p157_p7 = scmp.lt.s32.totalorder %s151_s22, %s151_s22 }
  0x11   :  { %p158_p8 = por %p157_p7, %p156_p6 }
  0x13   :  { %p159_p9 = pnand %p158_p8, %p152_p5 }
  0x15   :  { %162 = shalt.err (!%p159_p9)
}
  0x16   :  { %33 = dma.hbm_to_vmem [thread:$0]  %s277_s1, 256, %s31_s18, [#allocation6]  }
  0x17   :  { %223 = dma.done.wait [#allocation3], 256  }
  0x18   :  { %224 = vsyncadd [#allocation3], 4294967040 }
  0x19   :  { %225 = dma.done.wait [#allocation6], 256  }
  0x1a   :  { %226 = vsyncadd [#allocation6], 4294967040  ;;  %s233_s25 = smov [#allocation8]   ;;  %s234_s27 = smov [#allocation10]   ;;  %v52_v0 = vld [vmem:[#allocation5] sm:$0xff]  ;;  %v53_v1 = vld [vmem:[#allocation5 + $0x8] sm:$0xff] }
  0x1b   :  { %s90_s26 = sshll.u32 %s233_s25, 4  ;;  %s100_s28 = sshll.u32 %s234_s27, 4  ;;  %v50_v2 = vld [vmem:[#allocation2] sm:$0xff]  ;;  %v51_v4 = vld [vmem:[#allocation2 + $0x8] sm:$0xff]  ;;  %66 = vst [vmem:[#allocation8] sm:$0xff] %v52_v0  ;;  %67 = vst [vmem:[#allocation8 + $0x8] sm:$0xff] %v53_v1  ;;  %s91_s26 = int_to_ptr.vmem [resolvable:$true] %s90_s26  ;;  %s101_s28 = int_to_ptr.vmem [resolvable:$true] %s100_s28 }
  0x1c   :  { %s235_s0 = smov [#allocation7]   ;;  %v56_v3 = vmul.f32 %v52_v0, %v50_v2  ;;  %v57_v5 = vmul.f32 %v53_v1, %v51_v4  ;;  %72 = vst [vmem:[#allocation10] sm:$0xff] %v50_v2  ;;  %73 = vst [vmem:[#allocation10 + $0x8] sm:$0xff] %v51_v4  ;;  %s163_s1 = scalar_lea.vmem %s91_s26, 256 }
  0x1d   :  { %s80_s29 = sshll.u32 %s235_s0, 4  ;;  %p164_p10 = scmp.ne.s32.totalorder %s91_s26, %s163_s1  ;;  %s81_s29 = int_to_ptr.vmem [resolvable:$true] %s80_s29 }
  0x1e   :  { %p168_p11 = scmp.lt.s32.totalorder %s91_s26, %s91_s26  ;;  %p169_p12 = scmp.lt.s32.totalorder %s163_s1, %s163_s1 }
  0x20   :  { %p170_p13 = por %p169_p12, %p168_p11 }
  0x22   :  { %p171_p0 = pnand %p170_p13, %p164_p10 }
  0x24   :  { %174 = shalt.err (!%p171_p0)
}
  0x25   :  { %93 = dma.vmem_to_hbm [thread:$0]  %s91_s26, 256, %s279_s3, [#allocation9]   ;;  %60 = vst [vmem:[#allocation7] sm:$0xff] %v56_v3 }
  0x26   :  { %s183_s6 = scalar_lea.vmem %s101_s28, 256  ;;  %p188_p2 = scmp.lt.s32.totalorder %s101_s28, %s101_s28 }
  0x27   :  { %p184_p1 = scmp.ne.s32.totalorder %s101_s28, %s183_s6  ;;  %p189_p3 = scmp.lt.s32.totalorder %s183_s6, %s183_s6 }
  0x29   :  { %p190_p4 = por %p189_p3, %p188_p2 }
  0x2b   :  { %p191_p5 = pnand %p190_p4, %p184_p1 }
  0x2d   :  { %194 = shalt.err (!%p191_p5)
}
  0x2e   :  { %103 = dma.vmem_to_hbm [thread:$0]  %s101_s28, 256, %s280_s4, [#allocation9]   ;;  %61 = vst [vmem:[#allocation7 + $0x8] sm:$0xff] %v57_v5 }
  0x2f   :  { %s203_s9 = scalar_lea.vmem %s81_s29, 256  ;;  %p208_p7 = scmp.lt.s32.totalorder %s81_s29, %s81_s29 }
  0x30   :  { %p204_p6 = scmp.ne.s32.totalorder %s81_s29, %s203_s9  ;;  %p209_p8 = scmp.lt.s32.totalorder %s203_s9, %s203_s9 }
  0x32   :  { %p210_p9 = por %p209_p8, %p208_p7 }
  0x34   :  { %p211_p10 = pnand %p210_p9, %p204_p6 }
  0x36   :  { %214 = shalt.err (!%p211_p10)
}
  0x37   :  { %83 = dma.vmem_to_hbm [thread:$0]  %s81_s29, 256, %s278_s2, [#allocation4]  }
  0x38   :  { %227 = dma.done.wait [#allocation4], 256  }
  0x39   :  { %228 = vsyncadd [#allocation4], 4294967040 }
  0x3a   :  { %229 = dma.done.wait [#allocation9], 512  }
  0x3b   :  { %230 = vsyncadd [#allocation9], 4294966784 }
  0x3c   :  { %113 = vsyncpa [#allocation3], 1 }
  0x3d   :  { %114 = vsyncpa [#allocation6], 1 }
  0x3e   :  { %115 = vsyncpa [#allocation4], 1 }
  0x3f   :  { %116 = vsyncpa [#allocation9], 1 }

</bundles_post_ra>
